<compile_context>
chip_gen: v6e
topology: v6e:2x2x1
jax: 0.10.0
libtpu: 0.0.40
codegen_flags: <defaults>
</compile_context>

<pallas_src>
import jax
import jax.numpy as jnp
from jax.experimental import pallas as pl
from jax.experimental.pallas import tpu as pltpu


def _round_up(x, m):
    return ((x + m - 1) // m) * m


def dueling_net_kernel(x_ref, w1_ref, b1_ref, w2_ref, b2_ref,
                       weff_ref, beff_ref, out_ref):
    # Cast x f32 -> bf16 in-kernel (free VPU work; avoids a wrapper cast pass).
    x = x_ref[...].astype(w1_ref.dtype)
    # fc1 + relu (bf16 x bf16 -> f32 accumulate on the MXU)
    h1 = jnp.dot(x, w1_ref[...], preferred_element_type=jnp.float32)
    h1 = jnp.maximum(h1 + b1_ref[...], 0.0).astype(w2_ref.dtype)
    # fc2 + relu
    h2 = jnp.dot(h1, w2_ref[...], preferred_element_type=jnp.float32)
    h2 = jnp.maximum(h2 + b2_ref[...], 0.0).astype(weff_ref.dtype)
    # fused dueling head: out = h2 @ W_eff + b_eff  (== val + adv - mean(adv))
    out = jnp.dot(h2, weff_ref[...], preferred_element_type=jnp.float32) + beff_ref[...]
    out_ref[...] = out.astype(out_ref.dtype)


def prepare_params(params, *, dtype=jnp.bfloat16, lane_pad=128):
    """Fold value head + dueling combine into one effective weight matrix,
    pad its output dim to a lane-dense multiple of 128, cast weights to bf16.
    Biases are kept in f32 (folding is exact; only weights are quantized)."""
    w_adv, b_adv = params["w_adv"], params["b_adv"]
    w_v, b_v = params["w_v"], params["b_v"]
    n_out = w_adv.shape[1]
    # out = val + adv - mean(adv, axis=1)  ==  h2 @ W_eff + b_eff   (exact)
    w_eff = w_adv - jnp.mean(w_adv, axis=1, keepdims=True) + w_v
    b_eff = b_adv - jnp.mean(b_adv, axis=1, keepdims=True) + b_v
    n_out_p = _round_up(n_out, lane_pad)
    if n_out_p != n_out:
        w_eff = jnp.pad(w_eff, ((0, 0), (0, n_out_p - n_out)))
        b_eff = jnp.pad(b_eff, ((0, 0), (0, n_out_p - n_out)))
    return {
        "w1": params["w1"].astype(dtype), "b1": params["b1"],
        "w2": params["w2"].astype(dtype), "b2": params["b2"],
        "w_eff": w_eff.astype(dtype), "b_eff": b_eff,
        "n_out": n_out,
    }


def dueling_net_forward(x, prep, *, block_b=2048, min_grid_steps=2,
                        out_dtype=jnp.bfloat16):
    """x: (B, n_in) f32. prep: output of prepare_params.

    Returns the lane-padded (B, n_out_padded) Q-values; only columns
    [:, :prep["n_out"]] are meaningful. Downstream consumers should mask the
    pad lanes rather than slicing (a slice costs an extra HBM pass)."""
    B, n_in = x.shape
    w1, b1 = prep["w1"], prep["b1"]
    w2, b2 = prep["w2"], prep["b2"]
    w_eff, b_eff = prep["w_eff"], prep["b_eff"]
    n_mid = w1.shape[1]
    n_out_p = w_eff.shape[1]

    # Batch tile: as large as possible (amortize ~0.35us/step overhead), but
    # capped so the grid has >= min_grid_steps steps -- on v7x the "parallel"
    # batch axis then shards across both TensorCores. TB is a multiple of 8
    # (sublane constraint); the last grid step may be a masked partial block.
    TB = max(8, _round_up(pl.cdiv(B, min_grid_steps), 8))
    TB = min(block_b, TB)
    grid = (pl.cdiv(B, TB),)
    const = lambda i: (0, 0)

    out_itemsize = jnp.dtype(out_dtype).itemsize
    flops = 2 * B * (n_in * n_mid + n_mid * n_mid + n_mid * n_out_p)
    bytes_accessed = (
        x.size * x.dtype.itemsize                                   # f32 x read
        + sum(a.size * a.dtype.itemsize for a in (w1, b1, w2, b2, w_eff, b_eff))
        + B * n_out_p * out_itemsize                                # bf16 out write
    )

    # Note (v5e): if block_b is pushed to ~8192, pass
    # vmem_limit_bytes=64<<20 in CompilerParams (v5e default scoped VMEM is
    # 16 MiB). At the default block_b=2048 every generation fits comfortably.
    out = pl.pallas_call(
        dueling_net_kernel,
        out_shape=jax.ShapeDtypeStruct((B, n_out_p), out_dtype),
        grid=grid,
        in_specs=[
            pl.BlockSpec((TB, n_in), lambda i: (i, 0)),   # x: tiled over batch (f32)
            pl.BlockSpec((n_in, n_mid), const),           # w1 (bf16, VMEM-resident)
            pl.BlockSpec((1, n_mid), const),              # b1 (f32)
            pl.BlockSpec((n_mid, n_mid), const),          # w2 (bf16)
            pl.BlockSpec((1, n_mid), const),              # b2 (f32)
            pl.BlockSpec((n_mid, n_out_p), const),        # fused head weights (bf16)
            pl.BlockSpec((1, n_out_p), const),            # fused head bias (f32)
        ],
        out_specs=pl.BlockSpec((TB, n_out_p), lambda i: (i, 0)),
        compiler_params=pltpu.CompilerParams(
            dimension_semantics=("parallel",)),
        cost_estimate=pl.CostEstimate(flops=flops, transcendentals=0,
                                      bytes_accessed=bytes_accessed),
    )(x, w1, b1, w2, b2, w_eff, b_eff)
    return out


def init_params(key, n_in, n_mid, n_out):
    """Deterministic synthetic init (PyTorch-style uniform bounds), weights stored (in, out)."""
    def linear(k, fan_in, fan_out):
        kw, kb = jax.random.split(k)
        bound = 1.0 / jnp.sqrt(jnp.float32(fan_in))
        w = jax.random.uniform(kw, (fan_in, fan_out), jnp.float32, -bound, bound)
        b = jax.random.uniform(kb, (1, fan_out), jnp.float32, -bound, bound)
        return w, b

    k1, k2, k3, k4 = jax.random.split(key, 4)
    w1, b1 = linear(k1, n_in, n_mid)
    w2, b2 = linear(k2, n_mid, n_mid)
    w_adv, b_adv = linear(k3, n_mid, n_out)
    w_v, b_v = linear(k4, n_mid, 1)
    return {"w1": w1, "b1": b1, "w2": w2, "b2": b2,
            "w_adv": w_adv, "b_adv": b_adv, "w_v": w_v, "b_v": b_v}


def reference_forward(x, p):
    """Pure-JAX f32 reference mirroring the PyTorch module exactly (unfused)."""
    h1 = jax.nn.relu(x @ p["w1"] + p["b1"])
    h2 = jax.nn.relu(h1 @ p["w2"] + p["b2"])
    adv = h2 @ p["w_adv"] + p["b_adv"]
    val = h2 @ p["w_v"] + p["b_v"]                 # (B, 1), broadcasts like .expand
    return val + adv - jnp.mean(adv, axis=1, keepdims=True)


def reference_forward_bf16(x, prep):
    """Same math as the kernel (fused head, bf16 operands, f32 accumulation)."""
    xd = x.astype(prep["w1"].dtype)
    h1 = jnp.maximum(
        jnp.dot(xd, prep["w1"], preferred_element_type=jnp.float32) + prep["b1"], 0.0)
    h1 = h1.astype(prep["w2"].dtype)
    h2 = jnp.maximum(
        jnp.dot(h1, prep["w2"], preferred_element_type=jnp.float32) + prep["b2"], 0.0)
    h2 = h2.astype(prep["w_eff"].dtype)
    out = jnp.dot(h2, prep["w_eff"], preferred_element_type=jnp.float32) + prep["b_eff"]
    return out[:, :prep["n_out"]]


if __name__ == "__main__":
    # Small shapes consistent with the MLP: batch=8, n_in=64, n_mid=128, n_out=16
    B, n_in, n_mid, n_out = 8, 64, 128, 16

    key = jax.random.PRNGKey(0)
    kx, kp = jax.random.split(key)
    x = jax.random.normal(kx, (B, n_in), dtype=jnp.float32)
    params = init_params(kp, n_in, n_mid, n_out)
    prep = prepare_params(params)

    q_padded = dueling_net_forward(x, prep)
    q_padded = jax.block_until_ready(q_padded)
    assert q_padded.shape == (B, prep["w_eff"].shape[1])

    # Downstream RL code should consume the lane-padded layout directly (mask
    # pad columns in the argmax / TD target); slice here only for checking.
    q = q_padded[:, :prep["n_out"]].astype(jnp.float32)
    assert q.shape == (B, n_out)

    # Check against an identically-quantized (bf16-operand) reference; the only
    # extra error is the bf16 output cast (<= ~0.2% relative).
    ref_q = reference_forward_bf16(x, prep)
    assert jnp.allclose(q, ref_q, atol=5e-3, rtol=5e-3), "mismatch vs bf16 reference"

    # Looser check against the exact f32 PyTorch-semantics reference
    # (differences are bf16 quantization + reassociation only).
    ref = reference_forward(x, params)
    assert jnp.allclose(q, ref, atol=5e-2, rtol=5e-2), "mismatch vs exact f32 reference"

    print("KERNEL_OK")
</pallas_src>

<mosaic_0001>
module attributes {stable_mosaic.version = 11 : i64} {
  func.func @dueling_net_kernel(%arg0: i32, %arg1: memref<8x64xf32, #tpu.memory_space<vmem>>, %arg2: memref<64x128xbf16, #tpu.memory_space<vmem>>, %arg3: memref<1x128xf32, #tpu.memory_space<vmem>>, %arg4: memref<128x128xbf16, #tpu.memory_space<vmem>>, %arg5: memref<1x128xf32, #tpu.memory_space<vmem>>, %arg6: memref<128x128xbf16, #tpu.memory_space<vmem>>, %arg7: memref<1x128xf32, #tpu.memory_space<vmem>>, %arg8: memref<8x128xbf16, #tpu.memory_space<vmem>>) attributes {dimension_semantics = [#tpu.dimension_semantics<parallel>], iteration_bounds = array<i64: 1>, scalar_prefetch = 0 : i64, scratch_operands = 0 : i64, tpu.core_type = #tpu.core_type<tc>, window_params = [{transform_indices = @transform_0, window_bounds = array<i64: 8, 64>}, {pipeline_mode = #tpu.pipeline_mode<synchronous>, transform_indices = @transform_1, window_bounds = array<i64: 64, 128>}, {pipeline_mode = #tpu.pipeline_mode<synchronous>, transform_indices = @transform_2, window_bounds = array<i64: 1, 128>}, {pipeline_mode = #tpu.pipeline_mode<synchronous>, transform_indices = @transform_3, window_bounds = array<i64: 128, 128>}, {pipeline_mode = #tpu.pipeline_mode<synchronous>, transform_indices = @transform_4, window_bounds = array<i64: 1, 128>}, {pipeline_mode = #tpu.pipeline_mode<synchronous>, transform_indices = @transform_5, window_bounds = array<i64: 128, 128>}, {pipeline_mode = #tpu.pipeline_mode<synchronous>, transform_indices = @transform_6, window_bounds = array<i64: 1, 128>}, {transform_indices = @transform_7, window_bounds = array<i64: 8, 128>}]} {
    %c0 = arith.constant 0 : index
    %c0_0 = arith.constant 0 : index
    %0 = vector.load %arg1[%c0, %c0_0] : memref<8x64xf32, #tpu.memory_space<vmem>>, vector<8x64xf32>
    %1 = arith.truncf %0 : vector<8x64xf32> to vector<8x64xbf16>
    %c0_1 = arith.constant 0 : index
    %c0_2 = arith.constant 0 : index
    %2 = vector.load %arg2[%c0_1, %c0_2] : memref<64x128xbf16, #tpu.memory_space<vmem>>, vector<64x128xbf16>
    %cst = arith.constant dense<0.000000e+00> : vector<8x128xf32>
    %3 = tpu.matmul %1, %2, %cst {dimension_numbers = #tpu.dot_dimension_numbers<[1], [0], [0], [1], [0, 0, 1, 1], [], []>} : vector<8x64xbf16>, vector<64x128xbf16>, vector<8x128xf32> -> vector<8x128xf32>
    %c0_3 = arith.constant 0 : index
    %c0_4 = arith.constant 0 : index
    %4 = vector.load %arg3[%c0_3, %c0_4] : memref<1x128xf32, #tpu.memory_space<vmem>>, vector<1x128xf32>
    %5 = vector.broadcast %4 : vector<1x128xf32> to vector<8x128xf32>
    %6 = arith.addf %3, %5 : vector<8x128xf32>
    %cst_5 = arith.constant 0.000000e+00 : f32
    %7 = vector.broadcast %cst_5 : f32 to vector<8x128xf32>
    %8 = arith.maximumf %6, %7 : vector<8x128xf32>
    %9 = arith.truncf %8 : vector<8x128xf32> to vector<8x128xbf16>
    %c0_6 = arith.constant 0 : index
    %c0_7 = arith.constant 0 : index
    %10 = vector.load %arg4[%c0_6, %c0_7] : memref<128x128xbf16, #tpu.memory_space<vmem>>, vector<128x128xbf16>
    %cst_8 = arith.constant dense<0.000000e+00> : vector<8x128xf32>
    %11 = tpu.matmul %9, %10, %cst_8 {dimension_numbers = #tpu.dot_dimension_numbers<[1], [0], [0], [1], [0, 0, 1, 1], [], []>} : vector<8x128xbf16>, vector<128x128xbf16>, vector<8x128xf32> -> vector<8x128xf32>
    %c0_9 = arith.constant 0 : index
    %c0_10 = arith.constant 0 : index
    %12 = vector.load %arg5[%c0_9, %c0_10] : memref<1x128xf32, #tpu.memory_space<vmem>>, vector<1x128xf32>
    %13 = vector.broadcast %12 : vector<1x128xf32> to vector<8x128xf32>
    %14 = arith.addf %11, %13 : vector<8x128xf32>
    %cst_11 = arith.constant 0.000000e+00 : f32
    %15 = vector.broadcast %cst_11 : f32 to vector<8x128xf32>
    %16 = arith.maximumf %14, %15 : vector<8x128xf32>
    %17 = arith.truncf %16 : vector<8x128xf32> to vector<8x128xbf16>
    %c0_12 = arith.constant 0 : index
    %c0_13 = arith.constant 0 : index
    %18 = vector.load %arg6[%c0_12, %c0_13] : memref<128x128xbf16, #tpu.memory_space<vmem>>, vector<128x128xbf16>
    %cst_14 = arith.constant dense<0.000000e+00> : vector<8x128xf32>
    %19 = tpu.matmul %17, %18, %cst_14 {dimension_numbers = #tpu.dot_dimension_numbers<[1], [0], [0], [1], [0, 0, 1, 1], [], []>} : vector<8x128xbf16>, vector<128x128xbf16>, vector<8x128xf32> -> vector<8x128xf32>
    %c0_15 = arith.constant 0 : index
    %c0_16 = arith.constant 0 : index
    %20 = vector.load %arg7[%c0_15, %c0_16] : memref<1x128xf32, #tpu.memory_space<vmem>>, vector<1x128xf32>
    %21 = vector.broadcast %20 : vector<1x128xf32> to vector<8x128xf32>
    %22 = arith.addf %19, %21 : vector<8x128xf32>
    %23 = arith.truncf %22 : vector<8x128xf32> to vector<8x128xbf16>
    %c0_17 = arith.constant 0 : index
    %c0_18 = arith.constant 0 : index
    %24 = vector.load %arg8[%c0_17, %c0_18] : memref<8x128xbf16, #tpu.memory_space<vmem>>, vector<8x128xbf16>
    tpu.vector_store %arg8[%c0_17, %c0_18], %23 {strides = array<i32>} : memref<8x128xbf16, #tpu.memory_space<vmem>>, vector<8x128xbf16>,
    return
  }
  func.func @transform_0(%arg0: i32) -> (i32, i32) {
    %c0_i32 = arith.constant 0 : i32
    %c0_i32_0 = arith.constant 0 : i32
    return %arg0, %c0_i32 : i32, i32
  }
  func.func @transform_1(%arg0: i32) -> (i32, i32) {
    %c0_i32 = arith.constant 0 : i32
    %c0_i32_0 = arith.constant 0 : i32
    %c0_i32_1 = arith.constant 0 : i32
    return %c0_i32, %c0_i32_0 : i32, i32
  }
  func.func @transform_2(%arg0: i32) -> (i32, i32) {
    %c0_i32 = arith.constant 0 : i32
    %c0_i32_0 = arith.constant 0 : i32
    %c0_i32_1 = arith.constant 0 : i32
    return %c0_i32, %c0_i32_0 : i32, i32
  }
  func.func @transform_3(%arg0: i32) -> (i32, i32) {
    %c0_i32 = arith.constant 0 : i32
    %c0_i32_0 = arith.constant 0 : i32
    %c0_i32_1 = arith.constant 0 : i32
    return %c0_i32, %c0_i32_0 : i32, i32
  }
  func.func @transform_4(%arg0: i32) -> (i32, i32) {
    %c0_i32 = arith.constant 0 : i32
    %c0_i32_0 = arith.constant 0 : i32
    %c0_i32_1 = arith.constant 0 : i32
    return %c0_i32, %c0_i32_0 : i32, i32
  }
  func.func @transform_5(%arg0: i32) -> (i32, i32) {
    %c0_i32 = arith.constant 0 : i32
    %c0_i32_0 = arith.constant 0 : i32
    %c0_i32_1 = arith.constant 0 : i32
    return %c0_i32, %c0_i32_0 : i32, i32
  }
  func.func @transform_6(%arg0: i32) -> (i32, i32) {
    %c0_i32 = arith.constant 0 : i32
    %c0_i32_0 = arith.constant 0 : i32
    %c0_i32_1 = arith.constant 0 : i32
    return %c0_i32, %c0_i32_0 : i32, i32
  }
  func.func @transform_7(%arg0: i32) -> (i32, i32) {
    %c0_i32 = arith.constant 0 : i32
    %c0_i32_0 = arith.constant 0 : i32
    return %arg0, %c0_i32 : i32, i32
  }
}

</mosaic_0001>

<bundles_post_ra>
// kernel: tpu_custom_call.1
= control target key start
LH: loop header
LB: loop body
LE: loop exit
PB: predicated region body
PF: predicated region fallthrough
CT: control target
= control target key end

     0   :  { %12 = vsyncpa [#allocation3], 0  ;;  %s755_s0 = inlined_call_operand.hbm [shape: f32[8,64], index: 0, kind: input, shape index: {}]   ;;  %s756_s1 = inlined_call_operand.hbm [shape: bf16[64,128], index: 1, kind: input, shape index: {}]   ;;  %s757_s2 = inlined_call_operand.vmem [shape: f32[1,128], index: 2, kind: input, shape index: {}]   ;;  %s758_s3 = inlined_call_operand.hbm [shape: bf16[128,128], index: 3, kind: input, shape index: {}]   ;;  %s759_s4 = inlined_call_operand.vmem [shape: f32[1,128], index: 4, kind: input, shape index: {}]   ;;  %s760_s5 = inlined_call_operand.hbm [shape: bf16[128,128], index: 5, kind: input, shape index: {}]   ;;  %s761_s6 = inlined_call_operand.vmem [shape: f32[1,128], index: 6, kind: input, shape index: {}]   ;;  %s762_s7 = inlined_call_operand.hbm [shape: bf16[8,128], index: 7, kind: output, shape index: {}]  }
   0x1   :  { %13 = vsyncpa [#allocation6], 0 }
   0x2   :  { %14 = vsyncpa [#allocation9], 0 }
   0x3   :  { %15 = vsyncpa [#allocation4], 0  ;;  %s647_s24 = smov [#allocation5]  }
   0x4   :  { %s31_s25 = sshll.u32 %s647_s24, 4  ;;  %s32_s25 = int_to_ptr.vmem [resolvable:$true] %s31_s25 }
   0x5   :  { %s547_s26 = scalar_lea.vmem %s32_s25, 512  ;;  %p552_p1 = scmp.lt.s32.totalorder %s32_s25, %s32_s25 }
   0x6   :  { %p548_p0 = scmp.ne.s32.totalorder %s32_s25, %s547_s26  ;;  %p553_p2 = scmp.lt.s32.totalorder %s547_s26, %s547_s26 }
   0x8   :  { %p554_p3 = por %p553_p2, %p552_p1 }
   0xa   :  { %p555_p4 = pnand %p554_p3, %p548_p0 }
   0xc   :  { %558 = shalt.err (!%p555_p4)
}
   0xd   :  { %s648_s27 = smov 64   ;;  %s649_s28 = smov 4  }
   0xe   :  { %37 = dma.hbm_to_vmem [thread:$0]  %s756_s1, 512, %s32_s25, [#allocation6], %s648_s27, %s648_s27, %s649_s28  }
   0xf   :  { %s650_s8 = smov [#allocation2]   ;;  %s651_s10 = smov [#allocation7]  }
  0x10   :  { %s22_s9 = sshll.u32 %s650_s8, 4  ;;  %s45_s11 = sshll.u32 %s651_s10, 4  ;;  %s23_s9 = int_to_ptr.vmem [resolvable:$true] %s22_s9  ;;  %s46_s11 = int_to_ptr.vmem [resolvable:$true] %s45_s11 }
  0x11   :  { %s567_s12 = scalar_lea.vmem %s23_s9, 128  ;;  %p572_p6 = scmp.lt.s32.totalorder %s23_s9, %s23_s9 }
  0x12   :  { %p568_p5 = scmp.ne.s32.totalorder %s23_s9, %s567_s12  ;;  %p573_p7 = scmp.lt.s32.totalorder %s567_s12, %s567_s12 }
  0x14   :  { %p574_p8 = por %p573_p7, %p572_p6 }
  0x16   :  { %p575_p9 = pnand %p574_p8, %p568_p5 }
  0x18   :  { %578 = shalt.err (!%p575_p9)
}
  0x19   :  { %25 = dma.hbm_to_vmem [thread:$0]  %s755_s0, 128, %s23_s9, [#allocation3]  }
  0x1a   :  { %s587_s15 = scalar_lea.vmem %s46_s11, 1024  ;;  %p592_p11 = scmp.lt.s32.totalorder %s46_s11, %s46_s11 }
  0x1b   :  { %p588_p10 = scmp.ne.s32.totalorder %s46_s11, %s587_s15  ;;  %p593_p12 = scmp.lt.s32.totalorder %s587_s15, %s587_s15 }
  0x1d   :  { %p594_p13 = por %p593_p12, %p592_p11 }
  0x1f   :  { %p595_p0 = pnand %p594_p13, %p588_p10 }
  0x21   :  { %598 = shalt.err (!%p595_p0)
}
  0x22   :  { %51 = dma.hbm_to_vmem [thread:$0]  %s758_s3, 1024, %s46_s11, [#allocation6], %s648_s27, %s648_s27, %s649_s28  }
  0x23   :  { %s652_s17 = smov [#allocation8]  }
  0x24   :  { %s59_s18 = sshll.u32 %s652_s17, 4  ;;  %s60_s18 = int_to_ptr.vmem [resolvable:$true] %s59_s18 }
  0x25   :  { %s607_s19 = scalar_lea.vmem %s60_s18, 1024  ;;  %p612_p2 = scmp.lt.s32.totalorder %s60_s18, %s60_s18 }
  0x26   :  { %p608_p1 = scmp.ne.s32.totalorder %s60_s18, %s607_s19  ;;  %p613_p3 = scmp.lt.s32.totalorder %s607_s19, %s607_s19 }
  0x28   :  { %p614_p4 = por %p613_p3, %p612_p2 }
  0x2a   :  { %p615_p5 = pnand %p614_p4, %p608_p1 }
  0x2c   :  { %618 = shalt.err (!%p615_p5)
}
  0x2d   :  { %65 = dma.hbm_to_vmem [thread:$0]  %s760_s5, 1024, %s60_s18, [#allocation9], %s648_s27, %s648_s27, %s649_s28  }
  0x2e   :  { %639 = dma.done.wait [#allocation3], 128  }
  0x2f   :  { %640 = vsyncadd [#allocation3], 4294967168 }
  0x30   :  { %641 = dma.done.wait [#allocation6], 1536  }
  0x31   :  { %642 = vsyncadd [#allocation6], 4294965760 }
  0x32   :  { %643 = dma.done.wait [#allocation9], 1024  }
  0x33   :  { %644 = vsyncadd [#allocation9], 4294966272  ;;  %v653_v0 = vmov 0.0   ;;  %vm654_vm0 = vmmov 0   ;;  %v519_v1 = vld [vmem:[#allocation5 + $0x18] sm:$0xff]   ;;  %v520_v2 = vld [vmem:[#allocation5 + $0x10] sm:$0xff]  }
  0x34   :  { %458 = vmatprep.subr.bf16.mxu0 %v653_v0  ;;  %466 = vmatprep.mubr.msk.bf16.mxu0 %vm654_vm0, %v653_v0  ;;  %v523_v3 = vld [vmem:[#allocation7 + $0x38] sm:$0xff]   ;;  %v521_v4 = vld [vmem:[#allocation5 + $0x8] sm:$0xff]   ;;  %v524_v5 = vld [vmem:[#allocation7 + $0x30] sm:$0xff]   ;;  %vm122_vm1 = vcmask 523264   ;;  %s655_s24 = smov [#allocation10]  }
  0x35   :  { %470 = vmatprep.subr.bf16.mxu1 %v653_v0  ;;  %486 = vmatprep.mubr.msk.bf16.mxu1 %vm654_vm0, %v653_v0  ;;  %v522_v6 = vld [vmem:[#allocation5] sm:$0xff]   ;;  %v81_v7 = vld [vmem:[#allocation2] sm:$0xff]  ;;  %v525_v8 = vld [vmem:[#allocation7 + $0x28] sm:$0xff]   ;;  %s400_s25 = sshll.u32 %s655_s24, 4  ;;  %s401_s25 = int_to_ptr.vmem [resolvable:$true] %s400_s25 }
  0x36   :  { %459 = vmatpush3.bf16.msra.mxu0 %v519_v1  ;;  %471 = vmatpush3.bf16.msra.mxu1 %v523_v3  ;;  %v82_v9 = vpack.c.bf16 %v81_v7, %v81_v7  ;;  %v526_v10 = vld [vmem:[#allocation7 + $0x20] sm:$0xff]   ;;  %v527_v11 = vld [vmem:[#allocation7 + $0x18] sm:$0xff]   ;;  %v528_v12 = vld [vmem:[#allocation7 + $0x10] sm:$0xff]   ;;  %p624_p7 = scmp.lt.s32.totalorder %s401_s25, %s401_s25 }
  0x37   :  { %460 = vmatprep.subr.bf16.mxu0 %v653_v0  ;;  %472 = vmatprep.subr.bf16.mxu1 %v653_v0  ;;  %v529_v13 = vld [vmem:[#allocation7 + $0x8] sm:$0xff]   ;;  %v530_v14 = vld [vmem:[#allocation7] sm:$0xff]   ;;  %v531_v15 = vld [vmem:[#allocation8 + $0x38] sm:$0xff]  }
  0x38   :  { %v532_v16 = vld [vmem:[#allocation8 + $0x30] sm:$0xff]   ;;  %v533_v17 = vld [vmem:[#allocation8 + $0x28] sm:$0xff]   ;;  %v534_v18 = vld [vmem:[#allocation8 + $0x20] sm:$0xff]  }
  0x39   :  { %v535_v19 = vld [vmem:[#allocation8 + $0x18] sm:$0xff]   ;;  %v536_v20 = vld [vmem:[#allocation8 + $0x10] sm:$0xff]   ;;  %v537_v29 = vld [vmem:[#allocation8 + $0x8] sm:$0xff]  }
  0x3a   :  { %461 = vmatpush3.bf16.msra.mxu0 %v520_v2  ;;  %473 = vmatpush3.bf16.msra.mxu1 %v524_v5  ;;  %v411_v21 = vld [vmem:[%s757_s2] ss:$0 sm:$0xff]  ;;  %v538_v30 = vld [vmem:[#allocation8] sm:$0xff]  }
  0x3b   :  { %462 = vmatprep.subr.bf16.mxu0 %v653_v0  ;;  %474 = vmatprep.subr.bf16.mxu1 %v653_v0  ;;  %v417_v31 = vld [vmem:[%s759_s4] ss:$0 sm:$0xff]  ;;  %s619_s4 = scalar_lea.vmem %s401_s25, 64 }
  0x3c   :  { %v426_v39 = vld [vmem:[%s761_s6] ss:$0 sm:$0xff]  ;;  %p620_p6 = scmp.ne.s32.totalorder %s401_s25, %s619_s4  ;;  %p625_p8 = scmp.lt.s32.totalorder %s619_s4, %s619_s4 }
  0x3e   :  { %463 = vmatpush3.bf16.msra.mxu0 %v521_v4  ;;  %475 = vmatpush3.bf16.msra.mxu1 %v525_v8  ;;  %p626_p9 = por %p625_p8, %p624_p7 }
  0x3f   :  { %464 = vmatprep.subr.bf16.mxu0 %v653_v0  ;;  %476 = vmatprep.subr.bf16.mxu1 %v653_v0 }
  0x40   :  { %p627_p10 = pnand %p626_p9, %p620_p6 }
  0x42   :  { %465 = vmatpush3.bf16.msra.mxu0 %v522_v6  ;;  %477 = vmatpush3.bf16.msra.mxu1 %v526_v10 }
  0x43   :  { %490 = vmatprep.subr.bf16.mxu0 %v653_v0  ;;  %478 = vmatprep.subr.bf16.mxu1 %v653_v0 }
  0x45   :  { %467 = vmatmul.mubr.msk.bf16.vlgmr.msra.gmra.mxu0 %vm122_vm1, %v82_v9 }
  0x46   :  { %506 = vmatprep.mubr.msk.bf16.mxu0 %vm654_vm0, %v653_v0  ;;  %479 = vmatpush3.bf16.msra.mxu1 %v527_v11 }
  0x47   :  { %480 = vmatprep.subr.bf16.mxu1 %v653_v0  ;;  %491 = vmatpush3.bf16.msra.mxu0 %v531_v15 }
  0x48   :  { %492 = vmatprep.subr.bf16.mxu0 %v653_v0 }
  0x4a   :  { %481 = vmatpush3.bf16.msra.mxu1 %v528_v12 }
  0x4b   :  { %482 = vmatprep.subr.bf16.mxu1 %v653_v0  ;;  %493 = vmatpush3.bf16.msra.mxu0 %v532_v16 }
  0x4c   :  { %494 = vmatprep.subr.bf16.mxu0 %v653_v0 }
  0x4e   :  { %483 = vmatpush3.bf16.msra.mxu1 %v529_v13 }
  0x4f   :  { %484 = vmatprep.subr.bf16.mxu1 %v653_v0  ;;  %495 = vmatpush3.bf16.msra.mxu0 %v533_v17 }
  0x50   :  { %496 = vmatprep.subr.bf16.mxu0 %v653_v0 }
  0x52   :  { %485 = vmatpush3.bf16.msra.mxu1 %v530_v14 }
  0x53   :  { %497 = vmatpush3.bf16.msra.mxu0 %v534_v18 }
  0x54   :  { %498 = vmatprep.subr.bf16.mxu0 %v653_v0 }
  0x57   :  { %499 = vmatpush3.bf16.msra.mxu0 %v535_v19 }
  0x58   :  { %500 = vmatprep.subr.bf16.mxu0 %v653_v0 }
  0x5b   :  { %501 = vmatpush3.bf16.msra.mxu0 %v536_v20 }
  0x5c   :  { %502 = vmatprep.subr.bf16.mxu0 %v653_v0 }
  0x5f   :  { %503 = vmatpush3.bf16.msra.mxu0 %v537_v29 }
  0x60   :  { %504 = vmatprep.subr.bf16.mxu0 %v653_v0 }
  0x63   :  { %505 = vmatpush3.bf16.msra.mxu0 %v538_v30 }
 0x105   :  { %v160_v22 = vpop.f32.mrf.mxu0 }
 0x106   :  { %v161_v23 = vadd.f32 %v411_v21, %v160_v22 }
 0x107   :  { %v468_v24 = vpop.f32.mrf.mxu0 }
 0x108   :  { %v166_v25 = vmax.f32 %v161_v23, 0.0 }
 0x109   :  { %v163_v26 = vpop.f32.mrf.mxu0 }
 0x10a   :  { %v167_v27 = vpack.c.bf16 %v166_v25, %v166_v25 }
 0x10b   :  { %v469_v28 = vpop.f32.mrf.mxu0 }
 0x10c   :  { %487 = vmatmul.mubr.bf16.vlgmr.msra.gmra.mxu1 %v167_v27 }
 0x1cc   :  { %v273_v32 = vpop.f32.mrf.mxu1 }
 0x1cd   :  { %v274_v33 = vadd.f32 %v417_v31, %v273_v32 }
 0x1ce   :  { %v488_v34 = vpop.f32.mrf.mxu1 }
 0x1cf   :  { %v279_v35 = vmax.f32 %v274_v33, 0.0 }
 0x1d0   :  { %v276_v36 = vpop.f32.mrf.mxu1 }
 0x1d1   :  { %v280_v37 = vpack.c.bf16 %v279_v35, %v279_v35 }
 0x1d2   :  { %v489_v38 = vpop.f32.mrf.mxu1 }
 0x1d3   :  { %507 = vmatmul.mubr.bf16.vlgmr.msra.gmra.mxu0 %v280_v37 }
 0x293   :  { %v386_v40 = vpop.f32.mrf.mxu0 }
 0x294   :  { %v387_v41 = vadd.f32 %v426_v39, %v386_v40 }
 0x295   :  { %v508_v42 = vpop.f32.mrf.mxu0 }
 0x296   :  { %v392_v43 = vpack.c.bf16 %v387_v41, %v387_v41 }
 0x297   :  { %v389_v44 = vpop.f32.mrf.mxu0 }
 0x298   :  { %393 = vst [vmem:[#allocation10] sm:$0xf] %v392_v43 }
 0x299   :  { %v509_v45 = vpop.f32.mrf.mxu0 }
 0x29a   :  { %630 = shalt.err (!%p627_p10)
}
 0x29b   :  { %403 = dma.vmem_to_hbm [thread:$0]  %s401_s25, 64, %s762_s7, [#allocation4]  }
 0x29c   :  { %645 = dma.done.wait [#allocation4], 64  }
 0x29d   :  { %646 = vsyncadd [#allocation4], 4294967232 }
 0x29e   :  { %407 = vsyncpa [#allocation3], 1 }
 0x29f   :  { %408 = vsyncpa [#allocation6], 1 }
 0x2a0   :  { %409 = vsyncpa [#allocation9], 1 }
 0x2a1   :  { %410 = vsyncpa [#allocation4], 1 }

</bundles_post_ra>
